<compile_context>
chip_gen: v7x
topology: tpu7x:2x2x1
jax: 0.10.0
libtpu: 0.0.40
codegen_flags: <defaults>
</compile_context>

<pallas_src>
import functools

import jax
import jax.numpy as jnp
from jax.experimental import pallas as pl
from jax.experimental.pallas import tpu as pltpu

EPS = 1e-6


def _round_up(n, m):
    return ((n + m - 1) // m) * m


def _cdiv(a, b):
    return -(-a // b)


def _vmem_capacity_bytes():
    try:
        return int(pltpu.get_tpu_info().vmem_capacity_bytes)
    except Exception:
        return 64 << 20  # conservative fallback: assume v7x-sized per-TC VMEM


def _encoder_norm_kernel(alpha_ref, bias_ref, x_ref, o_ref, *, d, k):
    """Row-wise LayerNormalization over k packed segments of width d.

    x_ref/o_ref: (rows, k*d) VMEM tiles (k*d lane-dense when D divides 128).
    alpha_ref/bias_ref: shape-(1,) f32 scalars in SMEM.

    NOTE: semantics intentionally mirror the PyTorch module — *unbiased* std
    (Bessel, N-1) and division by (std + eps), NOT rsqrt(var + eps).  Do not
    "fix" this to standard LayerNorm.
    """
    x = x_ref[...].astype(jnp.float32)  # f32 math (v5e VPU has no bf16)
    alpha = alpha_ref[0]
    bias = bias_ref[0]
    inv_d = jnp.float32(1.0 / d)
    inv_dm1 = jnp.float32(1.0 / max(d - 1, 1))  # d == 1 guarded (torch yields NaN)

    segs = []
    for j in range(k):  # static unroll; k*d == lane width (128) when folded
        xs = x[:, j * d:(j + 1) * d]
        mean = jnp.sum(xs, axis=-1, keepdims=True) * inv_d
        xc = xs - mean
        # Two-pass variance: robust to cancellation.
        var = jnp.sum(xc * xc, axis=-1, keepdims=True) * inv_dm1
        std = jnp.sqrt(var)
        # Exact divide (no approx reciprocal) for bit-accuracy vs the reference.
        segs.append(xc * (alpha / (std + jnp.float32(EPS))) + bias)

    y = segs[0] if k == 1 else jnp.concatenate(segs, axis=-1)
    o_ref[...] = y.astype(o_ref.dtype)
    # TODO(synk): for bf16 inputs on v6e/v7x the epilogue could run in bf16
    # (f32 moments only) to shrink the f32 temp; kept f32 for v5e portability.


def encoder_forward(x, mask, alpha, bias, *, target_tile_bytes=4 << 20):
    """Pallas implementation of Encoder.forward (identity layer list + LayerNormalization).

    x:     (B, S, D) float32 (or bf16)
    mask:  unused (layers are identity here)
    alpha: (1,) float32  (LayerNormalization.alpha)
    bias:  (1,) float32  (LayerNormalization.bias)
    """
    del mask  # layers are identity, so mask is unused
    B, S, D = x.shape
    N = B * S
    itemsize = jnp.dtype(x.dtype).itemsize

    # Lane-dense small-D repack: fold k rows per 128-lane vreg row when D | 128.
    k = 1
    if D < 128 and 128 % D == 0:
        k = 128 // D  # power of two
        while k > 1 and N % k:
            k //= 2
    # TODO(synk): D >= 128 but not a multiple of 128 still hits masked vst on the
    # lane tail; acceptable, just not optimal.
    M = N // k
    L = k * D
    x2 = x.reshape(M, L)  # contiguous row-major reshape: no HBM copy

    # ---- tile sizing: byte-targeted, generation-aware ----------------------
    align = max(8, 32 // itemsize)          # sublane packing: 8 f32, 16 bf16, 32 int8
    vmem_cap = _vmem_capacity_bytes()       # 128 MiB v5e/v6e, 64 MiB v7x (per TC)
    vmem_limit = int(min(vmem_cap * 3 // 4, 96 << 20))  # leave Mosaic scratch headroom

    # Per tile-row VMEM: double-buffered in + out tiles plus ~2 full-width f32
    # temporaries inside the kernel (upcast + centered x).
    bytes_per_row = 2 * 2 * L * itemsize + 2 * L * 4
    rows = max(align, min(target_tile_bytes // (L * itemsize),
                          (vmem_limit // 2) // bytes_per_row))
    rows = max(align, (rows // align) * align)
    # Make sure the row grid spans >= 2 steps when there is enough work, so the
    # "parallel" grid axis actually splits across both TensorCores on v7x.
    if M >= 2 * align:
        rows = min(rows, _round_up(_cdiv(M, 2), align))
    if M <= align:
        rows = M                             # block == full first dim (allowed)
    else:
        rows = min(rows, (M // align) * align)

    # No pad / slice round trips: ragged last tile is handled by Pallas.
    grid = (_cdiv(M, rows),)

    cost = pl.CostEstimate(
        flops=10 * N * D,
        transcendentals=2 * N,                  # sqrt + divide per row
        bytes_accessed=2 * N * D * itemsize,    # one read + one write of the slab
    )

    out2 = pl.pallas_call(
        functools.partial(_encoder_norm_kernel, d=D, k=k),
        out_shape=jax.ShapeDtypeStruct((M, L), x.dtype),
        grid_spec=pltpu.PrefetchScalarGridSpec(
            num_scalar_prefetch=0,
            grid=grid,
            in_specs=[
                pl.BlockSpec(memory_space=pltpu.MemorySpace.SMEM),  # alpha (1,)
                pl.BlockSpec(memory_space=pltpu.MemorySpace.SMEM),  # bias  (1,)
                pl.BlockSpec((rows, L), lambda i: (i, 0)),          # x row tile
            ],
            out_specs=pl.BlockSpec((rows, L), lambda i: (i, 0)),    # lane-dense out
        ),
        compiler_params=pltpu.CompilerParams(
            dimension_semantics=("parallel",),  # shard row tiles across TCs (v7x)
            vmem_limit_bytes=vmem_limit,
        ),
        cost_estimate=cost,
        # TODO(synk): add input_output_aliases={2: 0} when callers can donate x.
    )(alpha, bias, x2)

    return out2.reshape(B, S, D)


def reference_forward(x, alpha, bias):
    """Pure-JAX reference mirroring the PyTorch semantics."""
    mean = jnp.mean(x, axis=-1, keepdims=True)
    std = jnp.std(x, axis=-1, keepdims=True, ddof=1)  # unbiased, like torch.std()
    return alpha * (x - mean) / (std + EPS) + bias


if __name__ == "__main__":
    key = jax.random.PRNGKey(0)
    B, S, D = 2, 8, 32
    x = jax.random.normal(key, (B, S, D), dtype=jnp.float32)
    mask = jnp.ones((B, 1, 1, S), dtype=jnp.float32)  # unused (layers are identity)

    # Deterministic parameter init matching nn.Parameter(torch.ones(1)/zeros(1)).
    alpha = jnp.ones((1,), dtype=jnp.float32)
    bias = jnp.zeros((1,), dtype=jnp.float32)

    out = encoder_forward(x, mask, alpha, bias)
    out = jax.block_until_ready(out)

    ref = reference_forward(x, alpha, bias)
    assert out.shape == (B, S, D)
    assert jnp.allclose(out, ref, atol=1e-4, rtol=1e-4), "mismatch vs reference"

    print("KERNEL_OK")
</pallas_src>

<mosaic_0001>
module attributes {stable_mosaic.version = 11 : i64} {
  func.func @_encoder_norm_kernel(%arg0: i32, %arg1: memref<1xf32, #tpu.memory_space<smem>>, %arg2: memref<1xf32, #tpu.memory_space<smem>>, %arg3: memref<4x128xf32, #tpu.memory_space<vmem>>, %arg4: memref<4x128xf32, #tpu.memory_space<vmem>>) attributes {dimension_semantics = [#tpu.dimension_semantics<parallel>], iteration_bounds = array<i64: 1>, scalar_prefetch = 0 : i64, scratch_operands = 0 : i64, tpu.core_type = #tpu.core_type<tc>, window_params = [{transform_indices = @transform_0, window_bounds = array<i64: 1>}, {transform_indices = @transform_1, window_bounds = array<i64: 1>}, {transform_indices = @transform_2, window_bounds = array<i64: 4, 128>}, {transform_indices = @transform_3, window_bounds = array<i64: 4, 128>}]} {
    %c0 = arith.constant 0 : index
    %c0_0 = arith.constant 0 : index
    %0 = vector.load %arg3[%c0, %c0_0] : memref<4x128xf32, #tpu.memory_space<vmem>>, vector<4x128xf32>
    %c0_1 = arith.constant 0 : index
    %1 = memref.load %arg1[%c0_1] : memref<1xf32, #tpu.memory_space<smem>>
    %c0_2 = arith.constant 0 : index
    %2 = memref.load %arg2[%c0_2] : memref<1xf32, #tpu.memory_space<smem>>
    %3 = vector.extract_strided_slice %0 {offsets = [0, 0], sizes = [4, 32], strides = [1, 1]} : vector<4x128xf32> to vector<4x32xf32>
    %cst = arith.constant dense<0.000000e+00> : vector<4xf32>
    %4 = vector.multi_reduction <add>, %3, %cst [1] : vector<4x32xf32> to vector<4xf32>
    %5 = vector.shape_cast %4 : vector<4xf32> to vector<4x1xf32>
    %cst_3 = arith.constant 3.125000e-02 : f32
    %6 = vector.broadcast %cst_3 : f32 to vector<4x1xf32>
    %7 = arith.mulf %5, %6 : vector<4x1xf32>
    %8 = vector.broadcast %7 : vector<4x1xf32> to vector<4x32xf32>
    %9 = arith.subf %3, %8 : vector<4x32xf32>
    %10 = arith.mulf %9, %9 : vector<4x32xf32>
    %cst_4 = arith.constant dense<0.000000e+00> : vector<4xf32>
    %11 = vector.multi_reduction <add>, %10, %cst_4 [1] : vector<4x32xf32> to vector<4xf32>
    %12 = vector.shape_cast %11 : vector<4xf32> to vector<4x1xf32>
    %cst_5 = arith.constant 0.0322580636 : f32
    %13 = vector.broadcast %cst_5 : f32 to vector<4x1xf32>
    %14 = arith.mulf %12, %13 : vector<4x1xf32>
    %15 = math.sqrt %14 : vector<4x1xf32>
    %cst_6 = arith.constant 9.99999997E-7 : f32
    %16 = vector.broadcast %cst_6 : f32 to vector<4x1xf32>
    %17 = arith.addf %15, %16 : vector<4x1xf32>
    %18 = vector.broadcast %1 : f32 to vector<4x1xf32>
    %19 = arith.divf %18, %17 : vector<4x1xf32>
    %20 = vector.broadcast %19 : vector<4x1xf32> to vector<4x32xf32>
    %21 = arith.mulf %9, %20 : vector<4x32xf32>
    %22 = vector.broadcast %2 : f32 to vector<4x32xf32>
    %23 = arith.addf %21, %22 : vector<4x32xf32>
    %24 = vector.extract_strided_slice %0 {offsets = [0, 32], sizes = [4, 32], strides = [1, 1]} : vector<4x128xf32> to vector<4x32xf32>
    %cst_7 = arith.constant dense<0.000000e+00> : vector<4xf32>
    %25 = vector.multi_reduction <add>, %24, %cst_7 [1] : vector<4x32xf32> to vector<4xf32>
    %26 = vector.shape_cast %25 : vector<4xf32> to vector<4x1xf32>
    %cst_8 = arith.constant 3.125000e-02 : f32
    %27 = vector.broadcast %cst_8 : f32 to vector<4x1xf32>
    %28 = arith.mulf %26, %27 : vector<4x1xf32>
    %29 = vector.broadcast %28 : vector<4x1xf32> to vector<4x32xf32>
    %30 = arith.subf %24, %29 : vector<4x32xf32>
    %31 = arith.mulf %30, %30 : vector<4x32xf32>
    %cst_9 = arith.constant dense<0.000000e+00> : vector<4xf32>
    %32 = vector.multi_reduction <add>, %31, %cst_9 [1] : vector<4x32xf32> to vector<4xf32>
    %33 = vector.shape_cast %32 : vector<4xf32> to vector<4x1xf32>
    %cst_10 = arith.constant 0.0322580636 : f32
    %34 = vector.broadcast %cst_10 : f32 to vector<4x1xf32>
    %35 = arith.mulf %33, %34 : vector<4x1xf32>
    %36 = math.sqrt %35 : vector<4x1xf32>
    %cst_11 = arith.constant 9.99999997E-7 : f32
    %37 = vector.broadcast %cst_11 : f32 to vector<4x1xf32>
    %38 = arith.addf %36, %37 : vector<4x1xf32>
    %39 = vector.broadcast %1 : f32 to vector<4x1xf32>
    %40 = arith.divf %39, %38 : vector<4x1xf32>
    %41 = vector.broadcast %40 : vector<4x1xf32> to vector<4x32xf32>
    %42 = arith.mulf %30, %41 : vector<4x32xf32>
    %43 = vector.broadcast %2 : f32 to vector<4x32xf32>
    %44 = arith.addf %42, %43 : vector<4x32xf32>
    %45 = vector.extract_strided_slice %0 {offsets = [0, 64], sizes = [4, 32], strides = [1, 1]} : vector<4x128xf32> to vector<4x32xf32>
    %cst_12 = arith.constant dense<0.000000e+00> : vector<4xf32>
    %46 = vector.multi_reduction <add>, %45, %cst_12 [1] : vector<4x32xf32> to vector<4xf32>
    %47 = vector.shape_cast %46 : vector<4xf32> to vector<4x1xf32>
    %cst_13 = arith.constant 3.125000e-02 : f32
    %48 = vector.broadcast %cst_13 : f32 to vector<4x1xf32>
    %49 = arith.mulf %47, %48 : vector<4x1xf32>
    %50 = vector.broadcast %49 : vector<4x1xf32> to vector<4x32xf32>
    %51 = arith.subf %45, %50 : vector<4x32xf32>
    %52 = arith.mulf %51, %51 : vector<4x32xf32>
    %cst_14 = arith.constant dense<0.000000e+00> : vector<4xf32>
    %53 = vector.multi_reduction <add>, %52, %cst_14 [1] : vector<4x32xf32> to vector<4xf32>
    %54 = vector.shape_cast %53 : vector<4xf32> to vector<4x1xf32>
    %cst_15 = arith.constant 0.0322580636 : f32
    %55 = vector.broadcast %cst_15 : f32 to vector<4x1xf32>
    %56 = arith.mulf %54, %55 : vector<4x1xf32>
    %57 = math.sqrt %56 : vector<4x1xf32>
    %cst_16 = arith.constant 9.99999997E-7 : f32
    %58 = vector.broadcast %cst_16 : f32 to vector<4x1xf32>
    %59 = arith.addf %57, %58 : vector<4x1xf32>
    %60 = vector.broadcast %1 : f32 to vector<4x1xf32>
    %61 = arith.divf %60, %59 : vector<4x1xf32>
    %62 = vector.broadcast %61 : vector<4x1xf32> to vector<4x32xf32>
    %63 = arith.mulf %51, %62 : vector<4x32xf32>
    %64 = vector.broadcast %2 : f32 to vector<4x32xf32>
    %65 = arith.addf %63, %64 : vector<4x32xf32>
    %66 = vector.extract_strided_slice %0 {offsets = [0, 96], sizes = [4, 32], strides = [1, 1]} : vector<4x128xf32> to vector<4x32xf32>
    %cst_17 = arith.constant dense<0.000000e+00> : vector<4xf32>
    %67 = vector.multi_reduction <add>, %66, %cst_17 [1] : vector<4x32xf32> to vector<4xf32>
    %68 = vector.shape_cast %67 : vector<4xf32> to vector<4x1xf32>
    %cst_18 = arith.constant 3.125000e-02 : f32
    %69 = vector.broadcast %cst_18 : f32 to vector<4x1xf32>
    %70 = arith.mulf %68, %69 : vector<4x1xf32>
    %71 = vector.broadcast %70 : vector<4x1xf32> to vector<4x32xf32>
    %72 = arith.subf %66, %71 : vector<4x32xf32>
    %73 = arith.mulf %72, %72 : vector<4x32xf32>
    %cst_19 = arith.constant dense<0.000000e+00> : vector<4xf32>
    %74 = vector.multi_reduction <add>, %73, %cst_19 [1] : vector<4x32xf32> to vector<4xf32>
    %75 = vector.shape_cast %74 : vector<4xf32> to vector<4x1xf32>
    %cst_20 = arith.constant 0.0322580636 : f32
    %76 = vector.broadcast %cst_20 : f32 to vector<4x1xf32>
    %77 = arith.mulf %75, %76 : vector<4x1xf32>
    %78 = math.sqrt %77 : vector<4x1xf32>
    %cst_21 = arith.constant 9.99999997E-7 : f32
    %79 = vector.broadcast %cst_21 : f32 to vector<4x1xf32>
    %80 = arith.addf %78, %79 : vector<4x1xf32>
    %81 = vector.broadcast %1 : f32 to vector<4x1xf32>
    %82 = arith.divf %81, %80 : vector<4x1xf32>
    %83 = vector.broadcast %82 : vector<4x1xf32> to vector<4x32xf32>
    %84 = arith.mulf %72, %83 : vector<4x32xf32>
    %85 = vector.broadcast %2 : f32 to vector<4x32xf32>
    %86 = arith.addf %84, %85 : vector<4x32xf32>
    %87 = tpu.concatenate %23, %44, %65, %86 in 1 : vector<4x32xf32>, vector<4x32xf32>, vector<4x32xf32>, vector<4x32xf32> -> vector<4x128xf32>
    %c0_22 = arith.constant 0 : index
    %c0_23 = arith.constant 0 : index
    %88 = vector.load %arg4[%c0_22, %c0_23] : memref<4x128xf32, #tpu.memory_space<vmem>>, vector<4x128xf32>
    tpu.vector_store %arg4[%c0_22, %c0_23], %87 {strides = array<i32>} : memref<4x128xf32, #tpu.memory_space<vmem>>, vector<4x128xf32>,
    return
  }
  func.func @transform_0(%arg0: i32) -> i32 {
    %c0_i32 = arith.constant 0 : i32
    %c0_i32_0 = arith.constant 0 : i32
    return %c0_i32 : i32
  }
  func.func @transform_1(%arg0: i32) -> i32 {
    %c0_i32 = arith.constant 0 : i32
    %c0_i32_0 = arith.constant 0 : i32
    return %c0_i32 : i32
  }
  func.func @transform_2(%arg0: i32) -> (i32, i32) {
    %c0_i32 = arith.constant 0 : i32
    %c0_i32_0 = arith.constant 0 : i32
    return %arg0, %c0_i32 : i32, i32
  }
  func.func @transform_3(%arg0: i32) -> (i32, i32) {
    %c0_i32 = arith.constant 0 : i32
    %c0_i32_0 = arith.constant 0 : i32
    return %arg0, %c0_i32 : i32, i32
  }
}

</mosaic_0001>

<bundles_post_ra>
// kernel: tpu_custom_call.1
= control target key start
LH: loop header
LB: loop body
LE: loop exit
PB: predicated region body
PF: predicated region fallthrough
CT: control target
= control target key end

     0   :  { %s198_s14 = smov 96   ;;  %s271_s0 = inlined_call_operand.<no memory space> [shape: f32[1], index: 0, kind: input, shape index: {}]   ;;  %s272_s1 = inlined_call_operand.<no memory space> [shape: f32[1], index: 1, kind: input, shape index: {}]   ;;  %s273_s2 = inlined_call_operand.vmem [shape: f32[4,128], index: 2, kind: input, shape index: {}]   ;;  %s274_s3 = inlined_call_operand.hbm [shape: f32[4,128], index: 3, kind: output, shape index: {}]  }
   0x1   :  { %v17_v0 = vld [vmem:[%s273_s2] sm:$0xf] }
   0x2   :  { %46 = vrot.lane.b32.xlu0 %v17_v0, %s198_s14 }
   0x3   :  { %10 = vsyncpa [#allocation5], 0  ;;  %s199_s15 = smov 32   ;;  %s200_s16 = smov 64   ;;  %vm20_vm0 = vcmask 257024   ;;  %vm133_vm9 = vcmask 261120  }
   0x4   :  { %104 = vrot.lane.b32.xlu1 %v17_v0, %s199_s15  ;;  %v21_v3 = vsel %vm20_vm0, %v17_v0, 0.0  ;;  %vm135_vm10 = vcmask 523264   ;;  %vm137_vm11 = vcmask 785408  }
   0x6   :  { %75 = vrot.lane.b32.xlu0 %v17_v0, %s200_s16 }
  0x74   :  { %v47_v1 = vpop.permute.xlu0 %46 }
  0x75   :  { %v49_v2 = vsel %vm20_vm0, %v47_v1, 0.0  ;;  %v39_v1 = vstv %s271_s0  ;;  %s201_s0 = smov [#allocation4]  }
  0x76   :  { %50 = vadd.xlane.f32.xlu1 %v49_v2  ;;  %v105_v5 = vpop.permute.xlu1 %104  ;;  %s146_s20 = sshll.u32 %s201_s0, 4  ;;  %s147_s20 = int_to_ptr.vmem [resolvable:$true] %s146_s20 }
  0x77   :  { %v107_v7 = vsel %vm20_vm0, %v105_v5, 0.0  ;;  %s174_s21 = scalar_lea.vmem %s147_s20, 64  ;;  %p179_p1 = scmp.lt.s32.totalorder %s147_s20, %s147_s20 }
  0x78   :  { %v76_v4 = vpop.permute.xlu0 %75  ;;  %p175_p0 = scmp.ne.s32.totalorder %s147_s20, %s174_s21  ;;  %p180_p2 = scmp.lt.s32.totalorder %s174_s21, %s174_s21 }
  0x79   :  { %v78_v6 = vsel %vm20_vm0, %v76_v4, 0.0 }
  0x7a   :  { %79 = vadd.xlane.f32.xlu0 %v78_v6  ;;  %22 = vadd.xlane.f32.xlu1 %v21_v3  ;;  %p181_p3 = por %p180_p2, %p179_p1 }
  0x7c   :  { %p182_p4 = pnand %p181_p3, %p175_p0 }
  0x7e   :  { %108 = vadd.xlane.f32.xlu0 %v107_v7 }
 0x103   :  { %v51_v8 = vpop.xlane.xlu1 %50 }
 0x104   :  { %v52_v9 = vmul.f32 0.03125, %v51_v8 }
 0x106   :  { %v229_v10 = vsub.f32 %v17_v0, %v52_v9 }
 0x107   :  { %v80_v11 = vpop.xlane.xlu0 %79  ;;  %v23_v20 = vpop.xlane.xlu1 %22 }
 0x108   :  { %v81_v12 = vmul.f32 0.03125, %v80_v11  ;;  %v54_v13 = vmul.f32 %v229_v10, %v229_v10  ;;  %v24_v21 = vmul.f32 0.03125, %v23_v20  ;;  %v43_v11 = vstv %s272_s1 }
 0x10a   :  { %v233_v14 = vsub.f32 %v17_v0, %v81_v12  ;;  %56 = vrot.lane.b32.xlu0 %v54_v13, %s198_s14  ;;  %v241_v22 = vsub.f32 %v17_v0, %v24_v21 }
 0x10b   :  { %v109_v15 = vpop.xlane.xlu0 %108 }
 0x10c   :  { %v110_v16 = vmul.f32 0.03125, %v109_v15  ;;  %v83_v17 = vmul.f32 %v233_v14, %v233_v14  ;;  %v26_v23 = vmul.f32 %v241_v22, %v241_v22 }
 0x10e   :  { %v237_v18 = vsub.f32 %v17_v0, %v110_v16  ;;  %85 = vrot.lane.b32.xlu1 %v83_v17, %s200_s16  ;;  %v27_v24 = vsel %vm20_vm0, %v26_v23, 0.0 }
 0x110   :  { %v112_v19 = vmul.f32 %v237_v18, %v237_v18 }
 0x112   :  { %114 = vrot.lane.b32.xlu1 %v112_v19, %s199_s15 }
 0x129   :  { %28 = vadd.xlane.f32.xlu0 %v27_v24 }
 0x17c   :  { %v57_v25 = vpop.permute.xlu0 %56 }
 0x17d   :  { %v59_v26 = vsel %vm20_vm0, %v57_v25, 0.0 }
 0x17e   :  { %60 = vadd.xlane.f32.xlu1 %v59_v26 }
 0x180   :  { %v86_v27 = vpop.permute.xlu1 %85 }
 0x181   :  { %v88_v28 = vsel %vm20_vm0, %v86_v27, 0.0 }
 0x182   :  { %89 = vadd.xlane.f32.xlu0 %v88_v28 }
 0x184   :  { %v115_v29 = vpop.permute.xlu1 %114 }
 0x185   :  { %v117_v30 = vsel %vm20_vm0, %v115_v29, 0.0 }
 0x186   :  { %118 = vadd.xlane.f32.xlu0 %v117_v30 }
 0x1b6   :  { %v29_v31 = vpop.xlane.xlu0 %28 }
 0x1b7   :  { %v30_v32 = vmul.f32 0.032258064, %v29_v31 }
 0x1b9   :  { %158 = vrsqrt.f32 %v30_v32  ;;  %vm33_vm1 = vcmp.eq.f32.partialorder %v30_v32, inf  ;;  %v36_v39 = vand.u32 2147483648, %v30_v32  ;;  %vm35_vm2 = vcmp.eq.f32.partialorder %v30_v32, 0.0 }
 0x1c3   :  { %v159_v35 = vpop.eup %158 }
 0x1c4   :  { %v32_v37 = vmul.f32 %v159_v35, %v30_v32 }
 0x1c6   :  { %v34_v41 = vsel %vm33_vm1, %v30_v32, %v32_v37 }
 0x1c7   :  { %v37_v43 = vsel %vm35_vm2, %v36_v39, %v34_v41 }
 0x1c8   :  { %v38_v46 = vadd.f32 1e-06, %v37_v43 }
 0x20b   :  { %v61_v33 = vpop.xlane.xlu1 %60 }
 0x20c   :  { %v62_v34 = vmul.f32 0.032258064, %v61_v33 }
 0x20e   :  { %160 = vrsqrt.f32 %v62_v34  ;;  %vm65_vm3 = vcmp.eq.f32.partialorder %v62_v34, inf  ;;  %v68_v47 = vand.u32 2147483648, %v62_v34  ;;  %vm67_vm4 = vcmp.eq.f32.partialorder %v62_v34, 0.0 }
 0x20f   :  { %v90_v36 = vpop.xlane.xlu0 %89 }
 0x210   :  { %v91_v38 = vmul.f32 0.032258064, %v90_v36 }
 0x212   :  { %162 = vrsqrt.f32 %v91_v38  ;;  %vm94_vm5 = vcmp.eq.f32.partialorder %v91_v38, inf  ;;  %v97_v53 = vand.u32 2147483648, %v91_v38  ;;  %vm96_vm6 = vcmp.eq.f32.partialorder %v91_v38, 0.0 }
 0x213   :  { %v119_v40 = vpop.xlane.xlu0 %118 }
 0x214   :  { %v120_v42 = vmul.f32 0.032258064, %v119_v40 }
 0x216   :  { %164 = vrsqrt.f32 %v120_v42  ;;  %vm123_vm7 = vcmp.eq.f32.partialorder %v120_v42, inf  ;;  %v126_v59 = vand.u32 2147483648, %v120_v42  ;;  %vm125_vm8 = vcmp.eq.f32.partialorder %v120_v42, 0.0 }
 0x217   :  { %166 = vrcp.f32 %v38_v46 }
 0x218   :  { %v161_v44 = vpop.eup %160 }
 0x219   :  { %v64_v45 = vmul.f32 %v161_v44, %v62_v34 }
 0x21b   :  { %v66_v48 = vsel %vm65_vm3, %v62_v34, %v64_v45 }
 0x21c   :  { %v163_v49 = vpop.eup %162  ;;  %v69_v50 = vsel %vm67_vm4, %v68_v47, %v66_v48 }
 0x21d   :  { %v70_v51 = vadd.f32 1e-06, %v69_v50  ;;  %v93_v52 = vmul.f32 %v163_v49, %v91_v38 }
 0x21f   :  { %168 = vrcp.f32 %v70_v51  ;;  %v95_v54 = vsel %vm94_vm5, %v91_v38, %v93_v52 }
 0x220   :  { %v165_v55 = vpop.eup %164  ;;  %v98_v56 = vsel %vm96_vm6, %v97_v53, %v95_v54 }
 0x221   :  { %v99_v57 = vadd.f32 1e-06, %v98_v56  ;;  %v122_v58 = vmul.f32 %v165_v55, %v120_v42  ;;  %v167_v63 = vpop.eup %166 }
 0x222   :  { %v41_v3 = vmul.f32 %v167_v63, %v39_v1 }
 0x223   :  { %170 = vrcp.f32 %v99_v57  ;;  %v124_v60 = vsel %vm123_vm7, %v120_v42, %v122_v58 }
 0x224   :  { %v127_v61 = vsel %vm125_vm8, %v126_v59, %v124_v60  ;;  %v42_v7 = vmul.f32 %v41_v3, %v241_v22 }
 0x225   :  { %v128_v62 = vadd.f32 1e-06, %v127_v61 }
 0x226   :  { %v44_v16 = vadd.f32 %v43_v11, %v42_v7 }
 0x227   :  { %172 = vrcp.f32 %v128_v62 }
 0x229   :  { %v169_v0 = vpop.eup %168 }
 0x22a   :  { %v72_v2 = vmul.f32 %v169_v0, %v39_v1 }
 0x22c   :  { %v73_v5 = vmul.f32 %v72_v2, %v229_v10 }
 0x22d   :  { %v171_v4 = vpop.eup %170 }
 0x22e   :  { %v101_v6 = vmul.f32 %v171_v4, %v39_v1  ;;  %v74_v12 = vadd.f32 %v73_v5, %v43_v11 }
 0x230   :  { %v102_v8 = vmul.f32 %v101_v6, %v233_v14  ;;  %v134_v19 = vsel %vm133_vm9, %v44_v16, %v74_v12 }
 0x231   :  { %v173_v9 = vpop.eup %172 }
 0x232   :  { %v130_v13 = vmul.f32 %v173_v9, %v39_v1  ;;  %v103_v15 = vadd.f32 %v102_v8, %v43_v11 }
 0x234   :  { %v131_v17 = vmul.f32 %v130_v13, %v237_v18  ;;  %v136_v20 = vsel %vm135_vm10, %v134_v19, %v103_v15 }
 0x236   :  { %v132_v10 = vadd.f32 %v131_v17, %v43_v11 }
 0x238   :  { %v138_v14 = vsel %vm137_vm11, %v136_v20, %v132_v10 }
 0x239   :  { %139 = vst [vmem:[#allocation4] sm:$0xf] %v138_v14 }
 0x23a   :  { %185 = shalt.err (!%p182_p4)
}
 0x23b   :  { %s186_s23 = scalar_lea.hbm %s274_s3, 64 }
 0x23c   :  { %p187_p5 = scmp.ne.s32.totalorder %s274_s3, %s186_s23  ;;  %p190_p6 = scmp.lt.u32.totalorder %s186_s23, %s274_s3 }
 0x23e   :  { %p192_p7 = pnand %p190_p6, %p187_p5 }
 0x240   :  { %195 = shalt.err (!%p192_p7)
}
 0x241   :  { %149 = dma.vmem_to_hbm [thread:$0]  %s147_s20, 64, %s274_s3, [#allocation5]  }
 0x242   :  { %196 = dma.done.wait [#allocation5], 64  }
 0x243   :  { %197 = vsyncadd [#allocation5], 4294967232 }
 0x244   :  { %153 = vsyncpa [#allocation5], 1 }

</bundles_post_ra>
